<compile_context>
chip_gen: v6e
topology: v6e:2x2x1
jax: 0.10.0
libtpu: 0.0.40
codegen_flags: <defaults>
</compile_context>

<pallas_src>
import math
import jax
import jax.numpy as jnp
from jax.experimental import pallas as pl
from jax.experimental.pallas import tpu as pltpu

HIDDEN = 20
TILE_B = 512        # default batch elements per grid step (lane axis); mult of 128
LANE = 128          # TPU lane width


def pinn_kernel(x_ref, w1_ref, b1_ref, w2_ref, b2_ref, w3_ref, b3_ref, o_ref):
    """One lane-dense batch tile of the PINN MLP forward pass.

    x_ref  : VMEM (1, B)        -- raw X values, batch on lanes
    w1_ref : VMEM (20, 1)       -- fc1_20 weight with normalization folded in
    b1_ref : VMEM (20, 1)       -- fc1_20 bias  with normalization folded in
    w2_ref : VMEM (20, 20)      -- fc20_20 weight, torch (out, in) layout
    b2_ref : VMEM (20, 1)
    w3_ref : VMEM (1, 20)       -- fc20_1 weight, torch (out, in) layout
    b3_ref : VMEM (1, 1)
    o_ref  : VMEM (1, B)
    """
    x = x_ref[...]                                     # (1, B)

    # fc1_20 (normalization already folded into w1/b1).  K=1 contraction is a
    # rank-1 outer product: do it on the VPU instead of wasting an MXU pass.
    h = w1_ref[...] * x + b1_ref[...]                  # (20,1)*(1,B)+(20,1) -> (20, B)

    # 7x (tanh -> fc20_20); python loop unrolls at trace time (7 iters, full
    # LLO scheduler visibility).  Weights/bias hoisted out of the loop.
    w2 = w2_ref[...]
    b2 = b2_ref[...]
    for _ in range(7):
        h = jnp.tanh(h)                                                       # EUP
        h = jnp.dot(w2, h, preferred_element_type=jnp.float32) + b2           # (20, B)

    # fc20_1
    out = jnp.dot(w3_ref[...], h, preferred_element_type=jnp.float32) + b3_ref[...]
    o_ref[...] = out.astype(o_ref.dtype)               # (1, B), lane-dense unmasked store


def pinns_forward(X, x_min, x_max, params, *, tile_b=TILE_B):
    """X: (N, 1) float32. Returns (N, 1) float32, matching PINNsModel.forward."""
    # Params kept in torch layouts:
    #   w1 (20,1), b1 (20,), w2 (20,20), b2 (20,), w3 (1,20), b3 (1,)
    w1, b1, w2, b2, w3, b3 = params
    N = X.shape[0]

    # Fold (X - x_min)/(x_max - x_min) into the first layer (one-time op).
    scale = 1.0 / (x_max - x_min)
    w1f = (w1 * scale).astype(jnp.float32)                                    # (20, 1)
    b1f = (b1.reshape(HIDDEN, 1) - w1 * (x_min * scale)).astype(jnp.float32)  # (20, 1)
    w2c = w2.astype(jnp.float32)                                              # (20, 20)
    b2c = b2.reshape(HIDDEN, 1).astype(jnp.float32)                           # (20, 1)
    w3c = w3.astype(jnp.float32)                                              # (1, 20)
    b3c = b3.reshape(1, 1).astype(jnp.float32)                                # (1, 1)

    # Adaptive tile: small N -> one snug tile (no padded-lane compute waste);
    # large N -> default tile so the grid keeps multiple parallel steps.
    n_pad128 = -(-N // LANE) * LANE
    tile_b = min(tile_b, n_pad128)
    n_pad = -(-n_pad128 // tile_b) * tile_b

    # Lane-dense layout: batch on the lane axis, padded to a tile multiple.
    x_row = jnp.zeros((1, n_pad), jnp.float32).at[0, :N].set(
        X.reshape(N).astype(jnp.float32))

    grid = (n_pad // tile_b,)
    fixed = lambda shape: pl.BlockSpec(shape, lambda i: (0, 0))

    y_row = pl.pallas_call(
        pinn_kernel,
        out_shape=jax.ShapeDtypeStruct((1, n_pad), jnp.float32),
        grid_spec=pltpu.PrefetchScalarGridSpec(
            num_scalar_prefetch=0,
            grid=grid,
            in_specs=[
                pl.BlockSpec((1, tile_b), lambda i: (0, i)),   # X row tile
                fixed((HIDDEN, 1)),        # w1 (folded)
                fixed((HIDDEN, 1)),        # b1 (folded)
                fixed((HIDDEN, HIDDEN)),   # w2 (20, 20)
                fixed((HIDDEN, 1)),        # b2 (20, 1)
                fixed((1, HIDDEN)),        # w3 (1, 20)
                fixed((1, 1)),             # b3 (1, 1)
            ],
            out_specs=pl.BlockSpec((1, tile_b), lambda i: (0, i)),
        ),
        compiler_params=pltpu.CompilerParams(
            dimension_semantics=("parallel",)),
    )(x_row, w1f, b1f, w2c, b2c, w3c, b3c)

    return y_row[0, :N].reshape(N, 1)


def init_params(key):
    """Deterministic Xavier-normal weights (gain=1.0), zero biases, matching
    nn.init in PINNsModel.__init__.  Torch layouts: weight = (out, in)."""
    k1, k2, k3 = jax.random.split(key, 3)

    def xavier_normal(k, fan_out, fan_in):
        std = math.sqrt(2.0 / (fan_in + fan_out))
        return std * jax.random.normal(k, (fan_out, fan_in), dtype=jnp.float32)

    w1 = xavier_normal(k1, HIDDEN, 1)          # fc1_20.weight  (20, 1)
    b1 = jnp.zeros((HIDDEN,), jnp.float32)
    w2 = xavier_normal(k2, HIDDEN, HIDDEN)     # fc20_20.weight (20, 20)
    b2 = jnp.zeros((HIDDEN,), jnp.float32)
    w3 = xavier_normal(k3, 1, HIDDEN)          # fc20_1.weight  (1, 20)
    b3 = jnp.zeros((1,), jnp.float32)
    return (w1, b1, w2, b2, w3, b3)


def reference_forward(X, x_min, x_max, params):
    """Pure-JAX reference in the original (N, feature) layout, torch semantics."""
    w1, b1, w2, b2, w3, b3 = params
    x_s = (X - x_min) / (x_max - x_min)
    out = x_s @ w1.T + b1
    for _ in range(7):
        out = jnp.tanh(out)
        out = out @ w2.T + b2
    return out @ w3.T + b3


if __name__ == "__main__":
    key = jax.random.PRNGKey(0)
    pkey, xkey = jax.random.split(key)
    params = init_params(pkey)

    # N = 1024 -> two grid steps of TILE_B=512 (keeps both v7x TensorCores busy).
    N = 1024
    x_min, x_max = 0.0, 2.0
    X = x_min + (x_max - x_min) * jax.random.uniform(xkey, (N, 1), dtype=jnp.float32)

    y = pinns_forward(X, x_min, x_max, params)
    jax.block_until_ready(y)

    y_ref = reference_forward(X, x_min, x_max, params)
    assert y.shape == (N, 1)
    assert jnp.allclose(y, y_ref, atol=3e-5, rtol=1e-5), "mismatch vs reference"

    # Also exercise the small-N / non-multiple-of-128 path (adaptive tile).
    X_small = x_min + (x_max - x_min) * jax.random.uniform(
        jax.random.PRNGKey(1), (300, 1), dtype=jnp.float32)
    y_small = pinns_forward(X_small, x_min, x_max, params)
    jax.block_until_ready(y_small)
    assert jnp.allclose(y_small, reference_forward(X_small, x_min, x_max, params),
                        atol=3e-5, rtol=1e-5), "mismatch vs reference (small N)"

    # TODO(synk): loss()/higherOrderDerivative() use autograd.grad + eval() of a
    # user equation string; differentiate the kernel with jax.grad outside.
    print("KERNEL_OK")
</pallas_src>

<mosaic_0001>
module attributes {stable_mosaic.version = 11 : i64} {
  func.func @pinn_kernel(%arg0: i32, %arg1: memref<1x512xf32, #tpu.memory_space<vmem>>, %arg2: memref<20x1xf32, #tpu.memory_space<vmem>>, %arg3: memref<20x1xf32, #tpu.memory_space<vmem>>, %arg4: memref<20x20xf32, #tpu.memory_space<vmem>>, %arg5: memref<20x1xf32, #tpu.memory_space<vmem>>, %arg6: memref<1x20xf32, #tpu.memory_space<vmem>>, %arg7: memref<1x1xf32, #tpu.memory_space<vmem>>, %arg8: memref<1x512xf32, #tpu.memory_space<vmem>>) attributes {dimension_semantics = [#tpu.dimension_semantics<parallel>], iteration_bounds = array<i64: 2>, scalar_prefetch = 0 : i64, scratch_operands = 0 : i64, tpu.core_type = #tpu.core_type<tc>, window_params = [{transform_indices = @transform_0, window_bounds = array<i64: 1, 512>}, {pipeline_mode = #tpu.pipeline_mode<synchronous>, transform_indices = @transform_1, window_bounds = array<i64: 20, 1>}, {pipeline_mode = #tpu.pipeline_mode<synchronous>, transform_indices = @transform_2, window_bounds = array<i64: 20, 1>}, {pipeline_mode = #tpu.pipeline_mode<synchronous>, transform_indices = @transform_3, window_bounds = array<i64: 20, 20>}, {pipeline_mode = #tpu.pipeline_mode<synchronous>, transform_indices = @transform_4, window_bounds = array<i64: 20, 1>}, {pipeline_mode = #tpu.pipeline_mode<synchronous>, transform_indices = @transform_5, window_bounds = array<i64: 1, 20>}, {pipeline_mode = #tpu.pipeline_mode<synchronous>, transform_indices = @transform_6, window_bounds = array<i64: 1, 1>}, {transform_indices = @transform_7, window_bounds = array<i64: 1, 512>}]} {
    %c0 = arith.constant 0 : index
    %c0_0 = arith.constant 0 : index
    %0 = vector.load %arg1[%c0, %c0_0] : memref<1x512xf32, #tpu.memory_space<vmem>>, vector<1x512xf32>
    %c0_1 = arith.constant 0 : index
    %c0_2 = arith.constant 0 : index
    %1 = vector.load %arg2[%c0_1, %c0_2] : memref<20x1xf32, #tpu.memory_space<vmem>>, vector<20x1xf32>
    %2 = vector.broadcast %1 : vector<20x1xf32> to vector<20x512xf32>
    %3 = vector.broadcast %0 : vector<1x512xf32> to vector<20x512xf32>
    %4 = arith.mulf %2, %3 : vector<20x512xf32>
    %c0_3 = arith.constant 0 : index
    %c0_4 = arith.constant 0 : index
    %5 = vector.load %arg3[%c0_3, %c0_4] : memref<20x1xf32, #tpu.memory_space<vmem>>, vector<20x1xf32>
    %6 = vector.broadcast %5 : vector<20x1xf32> to vector<20x512xf32>
    %7 = arith.addf %4, %6 : vector<20x512xf32>
    %c0_5 = arith.constant 0 : index
    %c0_6 = arith.constant 0 : index
    %8 = vector.load %arg4[%c0_5, %c0_6] : memref<20x20xf32, #tpu.memory_space<vmem>>, vector<20x20xf32>
    %c0_7 = arith.constant 0 : index
    %c0_8 = arith.constant 0 : index
    %9 = vector.load %arg5[%c0_7, %c0_8] : memref<20x1xf32, #tpu.memory_space<vmem>>, vector<20x1xf32>
    %10 = math.tanh %7 : vector<20x512xf32>
    %cst = arith.constant dense<0.000000e+00> : vector<20x512xf32>
    %11 = tpu.matmul %8, %10, %cst {dimension_numbers = #tpu.dot_dimension_numbers<[1], [0], [0], [1], [0, 0, 1, 1], [], []>} : vector<20x20xf32>, vector<20x512xf32>, vector<20x512xf32> -> vector<20x512xf32>
    %12 = vector.broadcast %9 : vector<20x1xf32> to vector<20x512xf32>
    %13 = arith.addf %11, %12 : vector<20x512xf32>
    %14 = math.tanh %13 : vector<20x512xf32>
    %cst_9 = arith.constant dense<0.000000e+00> : vector<20x512xf32>
    %15 = tpu.matmul %8, %14, %cst_9 {dimension_numbers = #tpu.dot_dimension_numbers<[1], [0], [0], [1], [0, 0, 1, 1], [], []>} : vector<20x20xf32>, vector<20x512xf32>, vector<20x512xf32> -> vector<20x512xf32>
    %16 = vector.broadcast %9 : vector<20x1xf32> to vector<20x512xf32>
    %17 = arith.addf %15, %16 : vector<20x512xf32>
    %18 = math.tanh %17 : vector<20x512xf32>
    %cst_10 = arith.constant dense<0.000000e+00> : vector<20x512xf32>
    %19 = tpu.matmul %8, %18, %cst_10 {dimension_numbers = #tpu.dot_dimension_numbers<[1], [0], [0], [1], [0, 0, 1, 1], [], []>} : vector<20x20xf32>, vector<20x512xf32>, vector<20x512xf32> -> vector<20x512xf32>
    %20 = vector.broadcast %9 : vector<20x1xf32> to vector<20x512xf32>
    %21 = arith.addf %19, %20 : vector<20x512xf32>
    %22 = math.tanh %21 : vector<20x512xf32>
    %cst_11 = arith.constant dense<0.000000e+00> : vector<20x512xf32>
    %23 = tpu.matmul %8, %22, %cst_11 {dimension_numbers = #tpu.dot_dimension_numbers<[1], [0], [0], [1], [0, 0, 1, 1], [], []>} : vector<20x20xf32>, vector<20x512xf32>, vector<20x512xf32> -> vector<20x512xf32>
    %24 = vector.broadcast %9 : vector<20x1xf32> to vector<20x512xf32>
    %25 = arith.addf %23, %24 : vector<20x512xf32>
    %26 = math.tanh %25 : vector<20x512xf32>
    %cst_12 = arith.constant dense<0.000000e+00> : vector<20x512xf32>
    %27 = tpu.matmul %8, %26, %cst_12 {dimension_numbers = #tpu.dot_dimension_numbers<[1], [0], [0], [1], [0, 0, 1, 1], [], []>} : vector<20x20xf32>, vector<20x512xf32>, vector<20x512xf32> -> vector<20x512xf32>
    %28 = vector.broadcast %9 : vector<20x1xf32> to vector<20x512xf32>
    %29 = arith.addf %27, %28 : vector<20x512xf32>
    %30 = math.tanh %29 : vector<20x512xf32>
    %cst_13 = arith.constant dense<0.000000e+00> : vector<20x512xf32>
    %31 = tpu.matmul %8, %30, %cst_13 {dimension_numbers = #tpu.dot_dimension_numbers<[1], [0], [0], [1], [0, 0, 1, 1], [], []>} : vector<20x20xf32>, vector<20x512xf32>, vector<20x512xf32> -> vector<20x512xf32>
    %32 = vector.broadcast %9 : vector<20x1xf32> to vector<20x512xf32>
    %33 = arith.addf %31, %32 : vector<20x512xf32>
    %34 = math.tanh %33 : vector<20x512xf32>
    %cst_14 = arith.constant dense<0.000000e+00> : vector<20x512xf32>
    %35 = tpu.matmul %8, %34, %cst_14 {dimension_numbers = #tpu.dot_dimension_numbers<[1], [0], [0], [1], [0, 0, 1, 1], [], []>} : vector<20x20xf32>, vector<20x512xf32>, vector<20x512xf32> -> vector<20x512xf32>
    %36 = vector.broadcast %9 : vector<20x1xf32> to vector<20x512xf32>
    %37 = arith.addf %35, %36 : vector<20x512xf32>
    %c0_15 = arith.constant 0 : index
    %c0_16 = arith.constant 0 : index
    %38 = vector.load %arg6[%c0_15, %c0_16] : memref<1x20xf32, #tpu.memory_space<vmem>>, vector<1x20xf32>
    %cst_17 = arith.constant dense<0.000000e+00> : vector<1x512xf32>
    %39 = tpu.matmul %38, %37, %cst_17 {dimension_numbers = #tpu.dot_dimension_numbers<[1], [0], [0], [1], [0, 0, 1, 1], [], []>} : vector<1x20xf32>, vector<20x512xf32>, vector<1x512xf32> -> vector<1x512xf32>
    %c0_18 = arith.constant 0 : index
    %c0_19 = arith.constant 0 : index
    %40 = vector.load %arg7[%c0_18, %c0_19] : memref<1x1xf32, #tpu.memory_space<vmem>>, vector<1x1xf32>
    %41 = vector.broadcast %40 : vector<1x1xf32> to vector<1x512xf32>
    %42 = arith.addf %39, %41 : vector<1x512xf32>
    %c0_20 = arith.constant 0 : index
    %c0_21 = arith.constant 0 : index
    %43 = vector.load %arg8[%c0_20, %c0_21] : memref<1x512xf32, #tpu.memory_space<vmem>>, vector<1x512xf32>
    tpu.vector_store %arg8[%c0_20, %c0_21], %42 {strides = array<i32>} : memref<1x512xf32, #tpu.memory_space<vmem>>, vector<1x512xf32>,
    return
  }
  func.func @transform_0(%arg0: i32) -> (i32, i32) {
    %c0_i32 = arith.constant 0 : i32
    %c0_i32_0 = arith.constant 0 : i32
    return %c0_i32, %arg0 : i32, i32
  }
  func.func @transform_1(%arg0: i32) -> (i32, i32) {
    %c0_i32 = arith.constant 0 : i32
    %c0_i32_0 = arith.constant 0 : i32
    %c0_i32_1 = arith.constant 0 : i32
    return %c0_i32, %c0_i32_0 : i32, i32
  }
  func.func @transform_2(%arg0: i32) -> (i32, i32) {
    %c0_i32 = arith.constant 0 : i32
    %c0_i32_0 = arith.constant 0 : i32
    %c0_i32_1 = arith.constant 0 : i32
    return %c0_i32, %c0_i32_0 : i32, i32
  }
  func.func @transform_3(%arg0: i32) -> (i32, i32) {
    %c0_i32 = arith.constant 0 : i32
    %c0_i32_0 = arith.constant 0 : i32
    %c0_i32_1 = arith.constant 0 : i32
    return %c0_i32, %c0_i32_0 : i32, i32
  }
  func.func @transform_4(%arg0: i32) -> (i32, i32) {
    %c0_i32 = arith.constant 0 : i32
    %c0_i32_0 = arith.constant 0 : i32
    %c0_i32_1 = arith.constant 0 : i32
    return %c0_i32, %c0_i32_0 : i32, i32
  }
  func.func @transform_5(%arg0: i32) -> (i32, i32) {
    %c0_i32 = arith.constant 0 : i32
    %c0_i32_0 = arith.constant 0 : i32
    %c0_i32_1 = arith.constant 0 : i32
    return %c0_i32, %c0_i32_0 : i32, i32
  }
  func.func @transform_6(%arg0: i32) -> (i32, i32) {
    %c0_i32 = arith.constant 0 : i32
    %c0_i32_0 = arith.constant 0 : i32
    %c0_i32_1 = arith.constant 0 : i32
    return %c0_i32, %c0_i32_0 : i32, i32
  }
  func.func @transform_7(%arg0: i32) -> (i32, i32) {
    %c0_i32 = arith.constant 0 : i32
    %c0_i32_0 = arith.constant 0 : i32
    return %c0_i32, %arg0 : i32, i32
  }
}

</mosaic_0001>

<bundles_post_ra>
// kernel: tpu_custom_call.1
= control target key start
LH: loop header
LB: loop body
LE: loop exit
PB: predicated region body
PF: predicated region fallthrough
CT: control target
= control target key end

     0   :  { %s2801_s0 = inlined_call_operand.vmem [shape: f32[1,1024], index: 0, kind: input, shape index: {}]   ;;  %s2802_s1 = inlined_call_operand.vmem [shape: f32[20,1], index: 1, kind: input, shape index: {}]   ;;  %s2803_s2 = inlined_call_operand.vmem [shape: f32[20,1], index: 2, kind: input, shape index: {}]   ;;  %s2804_s3 = inlined_call_operand.vmem [shape: f32[20,20], index: 3, kind: input, shape index: {}]   ;;  %s2805_s4 = inlined_call_operand.vmem [shape: f32[20,1], index: 4, kind: input, shape index: {}]   ;;  %s2806_s5 = inlined_call_operand.vmem [shape: f32[1,20], index: 5, kind: input, shape index: {}]   ;;  %s2807_s6 = inlined_call_operand.<no memory space> [shape: f32[1,1], index: 6, kind: input, shape index: {}]   ;;  %s2808_s7 = inlined_call_operand.hbm [shape: f32[1,1024], index: 7, kind: output, shape index: {}]  }
   0x1   :  { %v12_v0 = vstv %s2807_s6 }
   0x2   :  { %13 = vst [vmem:[#allocation2] sm:$0x1] %v12_v0 }
   0x3   :  { %14 = vsyncpa [#allocation4], 0 }
   0x4   :  { %16 = vsyncpa [#allocation4 + $0x1], 0  ;;  %s2405_s26 = smov 0   ;;  %s2407_s27 = smov 0  }
   0x5   :  { %s2409_s28 = smov 0   ;;  %s2411_s29 = smov 0  }
   0x6 LB: > { %s2426_s6 = sadd.s32 4294967295, %s2356_s29   ;;  %s1996_s30 = sadd.s32 4294967294, %s2356_s29   ;;  %s2356_s29 = sphi %s2411_s29, %s2814_s29   ;;  %s2352_s28 = sphi %s2409_s28, %s2813_s28   ;;  %s2348_s27 = sphi %s2407_s27, %s2812_s27   ;;  %s2344_s26 = sphi %s2405_s26, %s2811_s26  }
   0x7   : > { %s2430_s8 = sadd.s32 1, %s2356_s29   ;;  %s181_s9 = sadd.s32 1, %s2352_s28 }
   0x8   : > { %s178_s10 = ssub.s32 %s2356_s29, %s2430_s8  ;;  %p191_p0 = scmp.ne.s32.totalorder %s2352_s28, %s2348_s27 }
   0x9   : > { %p179_p1 = scmp.eq.s32.totalorder %s178_s10, 0  ;;  %p192_p2 = scmp.eq.s32.totalorder %s2426_s6, 1 }
   0xa   : > { %p197_p3 = scmp.ne.s32.totalorder %s2348_s27, %s2344_s26  ;;  %p198_p4 = scmp.eq.s32.totalorder %s1996_s30, 1 }
   0xb   : > { %s2441_s11 = scalar_select %p179_p1, %s2352_s28, %s181_s9  }
   0xc   : > { %p2443_p5 = por %p192_p2, %p191_p0  ;;  %p2447_p6 = por %p198_p4, %p197_p3 }
   0xd   : > { %p1999_p7 = scmp.ge.s32.totalorder %s2356_s29, 1  ;;  %p242_p8 = scmp.lt.s32.totalorder %s2356_s29, 3 }
   0xf   : > { %p243_p9 = pnand %p1999_p7, %p242_p8 }
  0x10   : > { %s2001_s17 = sshll.u32 (!%p243_p9), %s2426_s6, 2  ;;  %s270_s14 = sand.u32 (!%p243_p9), 1, %s2348_s27  }
  0x11   : > { %246 = sbr.rel (%p243_p9) target bundleno = 1960 (0x7a8), region = 48  ;;  %p274_p10 = scmp.lt.s32.totalorder (!%p243_p9), %s2001_s17, 7 }
  0x12   : > { %s2000_s15 = sshll.u32 (!%p243_p9), %s270_s14, 2  ;;  %s2083_s16 = sshll.u32 (!%p243_p9), %s2426_s6, 6 }
  0x13   : > { %s1938_s21 = scalar_lea.hbm (!%p243_p9), %s2808_s7, %s2083_s16  ;;  %s1926_s22 = scalar_lea.sflag (!%p243_p9), [#allocation4], %s270_s14 }
  0x14   : > { %s2361_s24 = smov (!%p243_p9), [#allocation3]  }
  0x15   : > { %s2300_s6 = sshll.u32 (!%p243_p9), %s2361_s24, 4  ;;  %s2301_s6 = int_to_ptr.vmem [resolvable:$false] %s2300_s6 }
  0x16   : > { %v333_v1 = vld [vmem:[%s2803_s2 + $0x10] sm:$0xf]  ;;  %v2358_v3 = vmov 0   ;;  %v281_v4 = vld [vmem:[%s2802_s1 + $0x8] sm:$0xff]  ;;  %v280_v5 = vld [vmem:[%s2802_s1] sm:$0xff]  ;;  %v2359_v12 = vmov 0.0   ;;  %v299_v13 = vlaneseq }
  0x17   : > { %v282_v2 = vld [vmem:[%s2802_s1 + $0x10] sm:$0xf]  ;;  %2127 = vset.pattern.permute.xlu1 %v2358_v3  ;;  %2126 = vset.pattern.permute.xlu0 %v2358_v3  ;;  %v332_v6 = vld [vmem:[%s2803_s2 + $0x8] sm:$0xff]  ;;  %v331_v7 = vld [vmem:[%s2803_s2] sm:$0xff]  ;;  %s2816_s17 = smov (!%p274_p10, %s2001_s17), 7  ;;  %vm404_vm0 = vcmask 1043456  }
  0x18   : > { %346 = vperm.xlu1 %2127, %v333_v1   ;;  %295 = vperm.xlu0 %2126, %v282_v2   ;;  %v366_v8 = vld [vmem:[%s2805_s4 + $0x10] sm:$0xf]  ;;  %v365_v9 = vld [vmem:[%s2805_s4 + $0x8] sm:$0xff]  ;;  %v364_v10 = vld [vmem:[%s2805_s4] sm:$0xff]  ;;  %v2484_v14 = vshrl.u32 %v299_v13, 7  ;;  %s276_s20 = scalar_lea.vmem %s2801_s0, %s2816_s17  ;;  %vm394_vm1 = vcmask 162816  }
  0x19   : > { %v1724_v11 = vld [vmem:[#allocation2] sm:$0x1]  ;;  %481 = vmatprep.mubr.f32.mxu0 %v2359_v12  ;;  %564 = vmatprep.mubr.f32.mxu1 %v2359_v12  ;;  %v2510_v3 = vld [vmem:[%s2804_s3 + $0x8] sm:$0xff]  ;;  %s272_s17 = scalar_lea.vmem [#allocation3], %s2000_s15  ;;  %vm1922_vm2 = vcmp.lt.s32.totalorder %v299_v13, 512  ;;  %s2302_s25 = scalar_lea.vmem %s2301_s6, 128 }
  0x1a   : > { %v305_v15 = vsub.s32 1, %v2484_v14  ;;  %v309_v16 = vsub.s32 2, %v2484_v14  ;;  %v313_v17 = vsub.s32 3, %v2484_v14  ;;  %v301_v18 = vsub.s32 0, %v2484_v14  ;;  %v279_v19 = vld [vmem:[%s276_s20] sm:$0xf] }
  0x1b   : > { %v2502_v62 = vld [vmem:[%s2804_s3] sm:$0xff]  ;;  %s1940_s18 = sshll.u32 %s272_s17, 4  ;;  %s1941_s18 = int_to_ptr.vmem [resolvable:$true] %s1940_s18 }
  0x1c   : > { %290 = vperm.xlu0 %2126, %v281_v4   ;;  %285 = vperm.xlu1 %2127, %v280_v5   ;;  %v306_v20 = vrot.slane %v279_v19, %v305_v15  ;;  %v310_v21 = vrot.slane %v279_v19, %v309_v16  ;;  %v314_v22 = vrot.slane %v279_v19, %v313_v17  ;;  %v2521_v4 = vld [vmem:[%s2804_s3 + $0x10] sm:$0xf]  ;;  %s2296_s23 = scalar_lea.vmem %s1941_s18, 64  ;;  %p2303_p0 = scmp.lt.s32.totalorder %s1941_s18, %s2301_s6 }
  0x1d   : > { %v302_v23 = vrot.slane %v279_v19, %v301_v18  ;;  %p2297_p11 = scmp.ne.s32.totalorder %s1941_s18, %s2296_s23  ;;  %p2304_p1 = scmp.lt.s32.totalorder %s2302_s25, %s2296_s23 }
  0x1f   : > { %p2298_p12 = pnand %p2297_p11, %p2443_p5  ;;  %p2305_p2 = por %p2304_p1, %p2303_p0 }
  0x20   : > { %341 = vperm.xlu0 %2126, %v332_v6   ;;  %336 = vperm.xlu1 %2127, %v331_v7  }
  0x21   : > { %p2299_p13 = pneg %p2298_p12 }
  0x23   : > { %p2306_p3 = pnand %p2305_p2, %p2299_p13 }
  0x24   : > { %391 = vperm.xlu0 %2126, %v366_v8   ;;  %386 = vperm.xlu1 %2127, %v365_v9  }
  0x28   : > { %381 = vperm.xlu0 %2126, %v364_v10   ;;  %1727 = vperm.xlu1 %2127, %v1724_v11  }
  0x93   : > { %v347_v24 = vpop.permute.xlu1 %346  ;;  %v296_v25 = vpop.permute.xlu0 %295 }
  0x94   : > { %v328_v26 = vmul.f32 %v306_v20, %v296_v25  ;;  %v329_v27 = vmul.f32 %v310_v21, %v296_v25  ;;  %v330_v28 = vmul.f32 %v314_v22, %v296_v25  ;;  %v327_v29 = vmul.f32 %v302_v23, %v296_v25 }
  0x96   : > { %v358_v30 = vadd.f32 %v347_v24, %v328_v26  ;;  %v359_v31 = vadd.f32 %v347_v24, %v329_v27  ;;  %v360_v32 = vadd.f32 %v347_v24, %v330_v28  ;;  %v357_v35 = vadd.f32 %v347_v24, %v327_v29 }
  0x97   : > { %v291_v33 = vpop.permute.xlu0 %290  ;;  %v286_v34 = vpop.permute.xlu1 %285 }
  0x98   : > { %2128 = vtanh.f32 %v358_v30  ;;  %v324_v36 = vmul.f32 %v306_v20, %v291_v33  ;;  %v325_v37 = vmul.f32 %v310_v21, %v291_v33  ;;  %v326_v38 = vmul.f32 %v314_v22, %v291_v33 }
  0x99   : > { %2130 = vtanh.f32 %v359_v31  ;;  %v322_v44 = vmul.f32 %v314_v22, %v286_v34  ;;  %v321_v45 = vmul.f32 %v310_v21, %v286_v34  ;;  %v323_v47 = vmul.f32 %v302_v23, %v291_v33 }
  0x9a   : > { %2132 = vtanh.f32 %v360_v32  ;;  %v320_v48 = vmul.f32 %v306_v20, %v286_v34  ;;  %v319_v50 = vmul.f32 %v302_v23, %v286_v34 }
  0x9b   : > { %v342_v39 = vpop.permute.xlu0 %341  ;;  %2134 = vtanh.f32 %v357_v35  ;;  %v337_v43 = vpop.permute.xlu1 %336 }
  0x9c   : > { %v354_v40 = vadd.f32 %v342_v39, %v324_v36  ;;  %v355_v41 = vadd.f32 %v342_v39, %v325_v37  ;;  %v356_v42 = vadd.f32 %v342_v39, %v326_v38  ;;  %v352_v46 = vadd.f32 %v337_v43, %v322_v44 }
  0x9d   : > { %v351_v49 = vadd.f32 %v337_v43, %v321_v45  ;;  %v353_v51 = vadd.f32 %v342_v39, %v323_v47  ;;  %v350_v52 = vadd.f32 %v337_v43, %v320_v48  ;;  %v349_v53 = vadd.f32 %v337_v43, %v319_v50 }
  0x9e   : > { %2136 = vtanh.f32 %v354_v40 }
  0x9f   : > { %2138 = vtanh.f32 %v355_v41  ;;  %v2532_v5 = vpop.permute.xlu0 %391  ;;  %v2537_v17 = vpop.permute.xlu1 %386 }
  0xa0   : > { %2140 = vtanh.f32 %v356_v42 }
  0xa1   : > { %2142 = vtanh.f32 %v352_v46 }
  0xa2   : > { %2144 = vtanh.f32 %v351_v49 }
  0xa3   : > { %2146 = vtanh.f32 %v353_v51  ;;  %v2534_v10 = vpop.permute.xlu0 %381 }
  0xa4   : > { %2148 = vtanh.f32 %v350_v52 }
  0xa5   : > { %v2129_v54 = vpop.eup %2128  ;;  %2150 = vtanh.f32 %v349_v53 }
  0xa6   : > { %v2131_v55 = vpop.eup %2130  ;;  %2002 = vmatprep.subr.msk.mxu0 %vm404_vm0, %v2129_v54 }
  0xa7   : > { %v2133_v56 = vpop.eup %2132 }
  0xa8   : > { %v2135_v57 = vpop.eup %2134  ;;  %2007 = vmatprep.subr.msk.mxu1 %vm404_vm0, %v2133_v56 }
  0xa9   : > { %2003 = vmatpush1.msk.msra.mxu0 %vm404_vm0, %v2135_v57  ;;  %2008 = vmatpush1.msk.msra.mxu1 %vm404_vm0, %v2131_v55 }
  0xab   : > { %v2137_v58 = vpop.eup %2136 }
  0xac   : > { %v2139_v59 = vpop.eup %2138  ;;  %445 = vmatprep.subr.mxu0 %v2137_v58 }
  0xad   : > { %v2141_v60 = vpop.eup %2140 }
  0xae   : > { %528 = vmatprep.subr.mxu1 %v2141_v60  ;;  %v2143_v61 = vpop.eup %2142 }
  0xaf   : > { %529 = vmatpush1.msra.mxu1 %v2139_v59  ;;  %v2145_v63 = vpop.eup %2144 }
  0xb0   : > { %530 = vmatprep.subr.mxu1 %v2143_v61  ;;  %v2147_v0 = vpop.eup %2146 }
  0xb1   : > { %531 = vmatpush1.msra.mxu1 %v2145_v63  ;;  %v2149_v1 = vpop.eup %2148  ;;  %446 = vmatpush1.msra.mxu0 %v2147_v0 }
  0xb2   : > { %2009 = vmatmul.mubr.msk.f32.vlgmr.msra.gmra.mxu1 %vm394_vm1, %v2502_v62  ;;  %v2151_v2 = vpop.eup %2150  ;;  %447 = vmatprep.subr.mxu0 %v2149_v1 }
  0xb3   : > { %570 = vmatprep.mubr.f32.mxu1 %v2359_v12  ;;  %448 = vmatpush1.msra.mxu0 %v2151_v2 }
  0xb4   : > { %2004 = vmatmul.mubr.msk.f32.vlgmr.msra.gmra.mxu0 %vm394_vm1, %v2502_v62 }
  0xb5   : > { %487 = vmatprep.mubr.f32.mxu0 %v2359_v12 }
  0xb6   : > { %2010 = vmatmul.mubr.msk.f32.gmra.mxu1 %vm394_vm1, %v2510_v3 }
  0xb7   : > { %576 = vmatprep.mubr.f32.mxu1 %v2359_v12 }
  0xb8   : > { %2005 = vmatmul.mubr.msk.f32.gmra.mxu0 %vm394_vm1, %v2510_v3 }
  0xb9   : > { %493 = vmatprep.mubr.f32.mxu0 %v2359_v12 }
  0xba   : > { %2011 = vmatmul.mubr.msk.f32.gmra.mxu1 %vm394_vm1, %v2521_v4 }
  0xbb   : > { %754 = vmatprep.mubr.f32.mxu1 %v2359_v12 }
  0xbc   : > { %2006 = vmatmul.mubr.msk.f32.gmra.mxu0 %vm394_vm1, %v2521_v4 }
  0xbd   : > { %671 = vmatprep.mubr.f32.mxu0 %v2359_v12 }
 0x172   : > { %v566_v6 = vpop.f32.mrf.mxu1 }
 0x173   : > { %v567_v15 = vadd.f32 %v566_v6, %v2534_v10 }
 0x174   : > { %v568_v7 = vpop.f32.mrf.mxu1  ;;  %v483_v8 = vpop.f32.mrf.mxu0 }
 0x175   : > { %v569_v19 = vadd.f32 %v568_v7, %v2534_v10  ;;  %2152 = vtanh.f32 %v567_v15  ;;  %v484_v35 = vadd.f32 %v483_v8, %v2534_v10 }
 0x176   : > { %v572_v9 = vpop.f32.mrf.mxu1  ;;  %v485_v11 = vpop.f32.mrf.mxu0 }
 0x177   : > { %v573_v21 = vadd.f32 %v572_v9, %v2537_v17  ;;  %2154 = vtanh.f32 %v569_v19  ;;  %v486_v34 = vadd.f32 %v485_v11, %v2534_v10 }
 0x178   : > { %v574_v16 = vpop.f32.mrf.mxu1  ;;  %v489_v20 = vpop.f32.mrf.mxu0 }
 0x179   : > { %v575_v26 = vadd.f32 %v574_v16, %v2537_v17  ;;  %2156 = vtanh.f32 %v573_v21  ;;  %v490_v33 = vadd.f32 %v489_v20, %v2537_v17 }
 0x17a   : > { %v578_v22 = vpop.f32.mrf.mxu1  ;;  %v491_v23 = vpop.f32.mrf.mxu0 }
 0x17b   : > { %v579_v24 = vadd.f32 %v578_v22, %v2532_v5  ;;  %v492_v31 = vadd.f32 %v491_v23, %v2537_v17 }
 0x17c   : > { %v580_v25 = vpop.f32.mrf.mxu1  ;;  %v495_v27 = vpop.f32.mrf.mxu0 }
 0x17d   : > { %v581_v28 = vadd.f32 %v580_v25, %v2532_v5  ;;  %v496_v29 = vadd.f32 %v495_v27, %v2532_v5 }
 0x17e   : > { %v497_v30 = vpop.f32.mrf.mxu0 }
 0x17f   : > { %2158 = vtanh.f32 %v581_v28  ;;  %v498_v32 = vadd.f32 %v497_v30, %v2532_v5 }
 0x180   : > { %2160 = vtanh.f32 %v579_v24 }
 0x181   : > { %2162 = vtanh.f32 %v575_v26 }
 0x182   : > { %2164 = vtanh.f32 %v498_v32  ;;  %v2153_v36 = vpop.eup %2152 }
 0x183   : > { %2166 = vtanh.f32 %v496_v29 }
 0x184   : > { %2168 = vtanh.f32 %v492_v31  ;;  %v2155_v37 = vpop.eup %2154 }
 0x185   : > { %2170 = vtanh.f32 %v490_v33 }
 0x186   : > { %2172 = vtanh.f32 %v486_v34  ;;  %v2157_v38 = vpop.eup %2156 }
 0x187   : > { %2174 = vtanh.f32 %v484_v35 }
 0x18c   : > { %v2159_v39 = vpop.eup %2158 }
 0x18d   : > { %v2161_v40 = vpop.eup %2160  ;;  %2017 = vmatprep.subr.msk.mxu1 %vm404_vm0, %v2159_v39 }
 0x18e   : > { %v2163_v41 = vpop.eup %2162  ;;  %2018 = vmatpush1.msk.msra.mxu1 %vm404_vm0, %v2161_v40 }
 0x18f   : > { %v2165_v42 = vpop.eup %2164  ;;  %718 = vmatprep.subr.mxu1 %v2163_v41 }
 0x190   : > { %v2167_v43 = vpop.eup %2166  ;;  %2012 = vmatprep.subr.msk.mxu0 %vm404_vm0, %v2165_v42  ;;  %719 = vmatpush1.msra.mxu1 %v2157_v38 }
 0x191   : > { %v2169_v44 = vpop.eup %2168  ;;  %2013 = vmatpush1.msk.msra.mxu0 %vm404_vm0, %v2167_v43  ;;  %720 = vmatprep.subr.mxu1 %v2155_v37 }
 0x192   : > { %v2171_v45 = vpop.eup %2170  ;;  %635 = vmatprep.subr.mxu0 %v2169_v44  ;;  %721 = vmatpush1.msra.mxu1 %v2153_v36 }
 0x193   : > { %v2173_v46 = vpop.eup %2172  ;;  %636 = vmatpush1.msra.mxu0 %v2171_v45  ;;  %2019 = vmatmul.mubr.msk.f32.vlgmr.msra.gmra.mxu1 %vm394_vm1, %v2502_v62 }
 0x194   : > { %v2175_v47 = vpop.eup %2174  ;;  %637 = vmatprep.subr.mxu0 %v2173_v46  ;;  %760 = vmatprep.mubr.f32.mxu1 %v2359_v12 }
 0x195   : > { %638 = vmatpush1.msra.mxu0 %v2175_v47 }
 0x196   : > { %2014 = vmatmul.mubr.msk.f32.vlgmr.msra.gmra.mxu0 %vm394_vm1, %v2502_v62 }
 0x197   : > { %677 = vmatprep.mubr.f32.mxu0 %v2359_v12  ;;  %2020 = vmatmul.mubr.msk.f32.gmra.mxu1 %vm394_vm1, %v2510_v3 }
 0x198   : > { %766 = vmatprep.mubr.f32.mxu1 %v2359_v12 }
 0x19a   : > { %2015 = vmatmul.mubr.msk.f32.gmra.mxu0 %vm394_vm1, %v2510_v3 }
 0x19b   : > { %683 = vmatprep.mubr.f32.mxu0 %v2359_v12  ;;  %2021 = vmatmul.mubr.msk.f32.gmra.mxu1 %vm394_vm1, %v2521_v4 }
 0x19c   : > { %944 = vmatprep.mubr.f32.mxu1 %v2359_v12 }
 0x19e   : > { %2016 = vmatmul.mubr.msk.f32.gmra.mxu0 %vm394_vm1, %v2521_v4 }
 0x19f   : > { %861 = vmatprep.mubr.f32.mxu0 %v2359_v12 }
 0x253   : > { %v756_v48 = vpop.f32.mrf.mxu1 }
 0x254   : > { %v757_v53 = vadd.f32 %v756_v48, %v2534_v10 }
 0x255   : > { %v758_v49 = vpop.f32.mrf.mxu1 }
 0x256   : > { %v673_v50 = vpop.f32.mrf.mxu0  ;;  %v759_v55 = vadd.f32 %v758_v49, %v2534_v10  ;;  %2176 = vtanh.f32 %v757_v53 }
 0x257   : > { %v762_v51 = vpop.f32.mrf.mxu1  ;;  %v674_v15 = vadd.f32 %v673_v50, %v2534_v10 }
 0x258   : > { %v675_v52 = vpop.f32.mrf.mxu0  ;;  %v763_v57 = vadd.f32 %v762_v51, %v2537_v17  ;;  %2178 = vtanh.f32 %v759_v55 }
 0x259   : > { %v764_v54 = vpop.f32.mrf.mxu1  ;;  %v676_v11 = vadd.f32 %v675_v52, %v2534_v10 }
 0x25a   : > { %v679_v56 = vpop.f32.mrf.mxu0  ;;  %v765_v63 = vadd.f32 %v764_v54, %v2537_v17  ;;  %2180 = vtanh.f32 %v763_v57 }
 0x25b   : > { %v768_v58 = vpop.f32.mrf.mxu1  ;;  %v680_v9 = vadd.f32 %v679_v56, %v2537_v17 }
 0x25c   : > { %v681_v59 = vpop.f32.mrf.mxu0  ;;  %v769_v60 = vadd.f32 %v768_v58, %v2532_v5 }
 0x25d   : > { %v770_v61 = vpop.f32.mrf.mxu1  ;;  %v682_v7 = vadd.f32 %v681_v59, %v2537_v17 }
 0x25e   : > { %v685_v0 = vpop.f32.mrf.mxu0  ;;  %v771_v1 = vadd.f32 %v770_v61, %v2532_v5 }
 0x25f   : > { %v686_v2 = vadd.f32 %v685_v0, %v2532_v5 }
 0x260   : > { %v687_v6 = vpop.f32.mrf.mxu0  ;;  %2182 = vtanh.f32 %v771_v1 }
 0x261   : > { %2184 = vtanh.f32 %v769_v60  ;;  %v688_v8 = vadd.f32 %v687_v6, %v2532_v5 }
 0x262   : > { %2186 = vtanh.f32 %v765_v63 }
 0x263   : > { %2188 = vtanh.f32 %v688_v8  ;;  %v2177_v16 = vpop.eup %2176 }
 0x264   : > { %2190 = vtanh.f32 %v686_v2 }
 0x265   : > { %2192 = vtanh.f32 %v682_v7  ;;  %v2179_v19 = vpop.eup %2178 }
 0x266   : > { %2194 = vtanh.f32 %v680_v9 }
 0x267   : > { %2196 = vtanh.f32 %v676_v11  ;;  %v2181_v20 = vpop.eup %2180 }
 0x268   : > { %2198 = vtanh.f32 %v674_v15 }
 0x26d   : > { %v2183_v21 = vpop.eup %2182 }
 0x26e   : > { %v2185_v22 = vpop.eup %2184  ;;  %2027 = vmatprep.subr.msk.mxu1 %vm404_vm0, %v2183_v21 }
 0x26f   : > { %v2187_v23 = vpop.eup %2186  ;;  %2028 = vmatpush1.msk.msra.mxu1 %vm404_vm0, %v2185_v22 }
 0x270   : > { %v2189_v24 = vpop.eup %2188  ;;  %908 = vmatprep.subr.mxu1 %v2187_v23 }
 0x271   : > { %v2191_v25 = vpop.eup %2190  ;;  %2022 = vmatprep.subr.msk.mxu0 %vm404_vm0, %v2189_v24  ;;  %909 = vmatpush1.msra.mxu1 %v2181_v20 }
 0x272   : > { %v2193_v26 = vpop.eup %2192  ;;  %2023 = vmatpush1.msk.msra.mxu0 %vm404_vm0, %v2191_v25  ;;  %910 = vmatprep.subr.mxu1 %v2179_v19 }
 0x273   : > { %v2195_v27 = vpop.eup %2194  ;;  %825 = vmatprep.subr.mxu0 %v2193_v26  ;;  %911 = vmatpush1.msra.mxu1 %v2177_v16 }
 0x274   : > { %v2197_v28 = vpop.eup %2196  ;;  %826 = vmatpush1.msra.mxu0 %v2195_v27  ;;  %2029 = vmatmul.mubr.msk.f32.vlgmr.msra.gmra.mxu1 %vm394_vm1, %v2502_v62 }
 0x275   : > { %v2199_v29 = vpop.eup %2198  ;;  %827 = vmatprep.subr.mxu0 %v2197_v28  ;;  %950 = vmatprep.mubr.f32.mxu1 %v2359_v12 }
 0x276   : > { %828 = vmatpush1.msra.mxu0 %v2199_v29 }
 0x277   : > { %2024 = vmatmul.mubr.msk.f32.vlgmr.msra.gmra.mxu0 %vm394_vm1, %v2502_v62 }
 0x278   : > { %867 = vmatprep.mubr.f32.mxu0 %v2359_v12  ;;  %2030 = vmatmul.mubr.msk.f32.gmra.mxu1 %vm394_vm1, %v2510_v3 }
 0x279   : > { %956 = vmatprep.mubr.f32.mxu1 %v2359_v12 }
 0x27b   : > { %2025 = vmatmul.mubr.msk.f32.gmra.mxu0 %vm394_vm1, %v2510_v3 }
 0x27c   : > { %873 = vmatprep.mubr.f32.mxu0 %v2359_v12  ;;  %2031 = vmatmul.mubr.msk.f32.gmra.mxu1 %vm394_vm1, %v2521_v4 }
 0x27d   : > { %1134 = vmatprep.mubr.f32.mxu1 %v2359_v12 }
 0x27f   : > { %2026 = vmatmul.mubr.msk.f32.gmra.mxu0 %vm394_vm1, %v2521_v4 }
 0x280   : > { %1051 = vmatprep.mubr.f32.mxu0 %v2359_v12 }
 0x334   : > { %v946_v30 = vpop.f32.mrf.mxu1 }
 0x335   : > { %v947_v35 = vadd.f32 %v946_v30, %v2534_v10 }
 0x336   : > { %v948_v31 = vpop.f32.mrf.mxu1 }
 0x337   : > { %v863_v32 = vpop.f32.mrf.mxu0  ;;  %v949_v37 = vadd.f32 %v948_v31, %v2534_v10  ;;  %2200 = vtanh.f32 %v947_v35 }
 0x338   : > { %v952_v33 = vpop.f32.mrf.mxu1  ;;  %v864_v53 = vadd.f32 %v863_v32, %v2534_v10 }
 0x339   : > { %v865_v34 = vpop.f32.mrf.mxu0  ;;  %v953_v39 = vadd.f32 %v952_v33, %v2537_v17  ;;  %2202 = vtanh.f32 %v949_v37 }
 0x33a   : > { %v954_v36 = vpop.f32.mrf.mxu1  ;;  %v866_v52 = vadd.f32 %v865_v34, %v2534_v10 }
 0x33b   : > { %v869_v38 = vpop.f32.mrf.mxu0  ;;  %v955_v44 = vadd.f32 %v954_v36, %v2537_v17  ;;  %2204 = vtanh.f32 %v953_v39 }
 0x33c   : > { %v958_v40 = vpop.f32.mrf.mxu1  ;;  %v870_v51 = vadd.f32 %v869_v38, %v2537_v17 }
 0x33d   : > { %v871_v41 = vpop.f32.mrf.mxu0  ;;  %v959_v42 = vadd.f32 %v958_v40, %v2532_v5 }
 0x33e   : > { %v960_v43 = vpop.f32.mrf.mxu1  ;;  %v872_v49 = vadd.f32 %v871_v41, %v2537_v17 }
 0x33f   : > { %v875_v45 = vpop.f32.mrf.mxu0  ;;  %v961_v46 = vadd.f32 %v960_v43, %v2532_v5 }
 0x340   : > { %v876_v47 = vadd.f32 %v875_v45, %v2532_v5 }
 0x341   : > { %v877_v48 = vpop.f32.mrf.mxu0  ;;  %2206 = vtanh.f32 %v961_v46 }
 0x342   : > { %2208 = vtanh.f32 %v959_v42  ;;  %v878_v50 = vadd.f32 %v877_v48, %v2532_v5 }
 0x343   : > { %2210 = vtanh.f32 %v955_v44 }
 0x344   : > { %2212 = vtanh.f32 %v878_v50  ;;  %v2201_v54 = vpop.eup %2200 }
 0x345   : > { %2214 = vtanh.f32 %v876_v47 }
 0x346   : > { %2216 = vtanh.f32 %v872_v49  ;;  %v2203_v55 = vpop.eup %2202 }
 0x347   : > { %2218 = vtanh.f32 %v870_v51 }
 0x348   : > { %2220 = vtanh.f32 %v866_v52  ;;  %v2205_v56 = vpop.eup %2204 }
 0x349   : > { %2222 = vtanh.f32 %v864_v53 }
 0x34e   : > { %v2207_v57 = vpop.eup %2206 }
 0x34f   : > { %v2209_v58 = vpop.eup %2208  ;;  %2037 = vmatprep.subr.msk.mxu1 %vm404_vm0, %v2207_v57 }
 0x350   : > { %v2211_v59 = vpop.eup %2210  ;;  %2038 = vmatpush1.msk.msra.mxu1 %vm404_vm0, %v2209_v58 }
 0x351   : > { %v2213_v60 = vpop.eup %2212  ;;  %1098 = vmatprep.subr.mxu1 %v2211_v59 }
 0x352   : > { %v2215_v61 = vpop.eup %2214  ;;  %2032 = vmatprep.subr.msk.mxu0 %vm404_vm0, %v2213_v60  ;;  %1099 = vmatpush1.msra.mxu1 %v2205_v56 }
 0x353   : > { %v2217_v63 = vpop.eup %2216  ;;  %2033 = vmatpush1.msk.msra.mxu0 %vm404_vm0, %v2215_v61  ;;  %1100 = vmatprep.subr.mxu1 %v2203_v55 }
 0x354   : > { %v2219_v0 = vpop.eup %2218  ;;  %1015 = vmatprep.subr.mxu0 %v2217_v63  ;;  %1101 = vmatpush1.msra.mxu1 %v2201_v54 }
 0x355   : > { %v2221_v1 = vpop.eup %2220  ;;  %1016 = vmatpush1.msra.mxu0 %v2219_v0  ;;  %2039 = vmatmul.mubr.msk.f32.vlgmr.msra.gmra.mxu1 %vm394_vm1, %v2502_v62 }
 0x356   : > { %v2223_v2 = vpop.eup %2222  ;;  %1017 = vmatprep.subr.mxu0 %v2221_v1  ;;  %1140 = vmatprep.mubr.f32.mxu1 %v2359_v12 }
 0x357   : > { %1018 = vmatpush1.msra.mxu0 %v2223_v2 }
 0x358   : > { %2034 = vmatmul.mubr.msk.f32.vlgmr.msra.gmra.mxu0 %vm394_vm1, %v2502_v62 }
 0x359   : > { %1057 = vmatprep.mubr.f32.mxu0 %v2359_v12  ;;  %2040 = vmatmul.mubr.msk.f32.gmra.mxu1 %vm394_vm1, %v2510_v3 }
 0x35a   : > { %1146 = vmatprep.mubr.f32.mxu1 %v2359_v12 }
 0x35c   : > { %2035 = vmatmul.mubr.msk.f32.gmra.mxu0 %vm394_vm1, %v2510_v3 }
 0x35d   : > { %1063 = vmatprep.mubr.f32.mxu0 %v2359_v12  ;;  %2041 = vmatmul.mubr.msk.f32.gmra.mxu1 %vm394_vm1, %v2521_v4 }
 0x35e   : > { %1324 = vmatprep.mubr.f32.mxu1 %v2359_v12 }
 0x360   : > { %2036 = vmatmul.mubr.msk.f32.gmra.mxu0 %vm394_vm1, %v2521_v4 }
 0x361   : > { %1241 = vmatprep.mubr.f32.mxu0 %v2359_v12 }
 0x415   : > { %v1136_v6 = vpop.f32.mrf.mxu1 }
 0x416   : > { %v1137_v15 = vadd.f32 %v1136_v6, %v2534_v10 }
 0x417   : > { %v1138_v7 = vpop.f32.mrf.mxu1 }
 0x418   : > { %v1053_v8 = vpop.f32.mrf.mxu0  ;;  %v1139_v19 = vadd.f32 %v1138_v7, %v2534_v10  ;;  %2224 = vtanh.f32 %v1137_v15 }
 0x419   : > { %v1142_v9 = vpop.f32.mrf.mxu1  ;;  %v1054_v35 = vadd.f32 %v1053_v8, %v2534_v10 }
 0x41a   : > { %v1055_v11 = vpop.f32.mrf.mxu0  ;;  %v1143_v21 = vadd.f32 %v1142_v9, %v2537_v17  ;;  %2226 = vtanh.f32 %v1139_v19 }
 0x41b   : > { %v1144_v16 = vpop.f32.mrf.mxu1  ;;  %v1056_v34 = vadd.f32 %v1055_v11, %v2534_v10 }
 0x41c   : > { %v1059_v20 = vpop.f32.mrf.mxu0  ;;  %v1145_v26 = vadd.f32 %v1144_v16, %v2537_v17  ;;  %2228 = vtanh.f32 %v1143_v21 }
 0x41d   : > { %v1148_v22 = vpop.f32.mrf.mxu1  ;;  %v1060_v33 = vadd.f32 %v1059_v20, %v2537_v17 }
 0x41e   : > { %v1061_v23 = vpop.f32.mrf.mxu0  ;;  %v1149_v24 = vadd.f32 %v1148_v22, %v2532_v5 }
 0x41f   : > { %v1150_v25 = vpop.f32.mrf.mxu1  ;;  %v1062_v31 = vadd.f32 %v1061_v23, %v2537_v17 }
 0x420   : > { %v1065_v27 = vpop.f32.mrf.mxu0  ;;  %v1151_v28 = vadd.f32 %v1150_v25, %v2532_v5 }
 0x421   : > { %v1066_v29 = vadd.f32 %v1065_v27, %v2532_v5 }
 0x422   : > { %v1067_v30 = vpop.f32.mrf.mxu0  ;;  %2230 = vtanh.f32 %v1151_v28 }
 0x423   : > { %2232 = vtanh.f32 %v1149_v24  ;;  %v1068_v32 = vadd.f32 %v1067_v30, %v2532_v5 }
 0x424   : > { %2234 = vtanh.f32 %v1145_v26 }
 0x425   : > { %2236 = vtanh.f32 %v1068_v32  ;;  %v2225_v36 = vpop.eup %2224 }
 0x426   : > { %2238 = vtanh.f32 %v1066_v29 }
 0x427   : > { %2240 = vtanh.f32 %v1062_v31  ;;  %v2227_v37 = vpop.eup %2226 }
 0x428   : > { %2242 = vtanh.f32 %v1060_v33 }
 0x429   : > { %2244 = vtanh.f32 %v1056_v34  ;;  %v2229_v38 = vpop.eup %2228 }
 0x42a   : > { %2246 = vtanh.f32 %v1054_v35 }
 0x42f   : > { %v2231_v39 = vpop.eup %2230 }
 0x430   : > { %v2233_v40 = vpop.eup %2232  ;;  %2047 = vmatprep.subr.msk.mxu1 %vm404_vm0, %v2231_v39 }
 0x431   : > { %v2235_v41 = vpop.eup %2234  ;;  %2048 = vmatpush1.msk.msra.mxu1 %vm404_vm0, %v2233_v40 }
 0x432   : > { %v2237_v42 = vpop.eup %2236  ;;  %1288 = vmatprep.subr.mxu1 %v2235_v41 }
 0x433   : > { %v2239_v43 = vpop.eup %2238  ;;  %2042 = vmatprep.subr.msk.mxu0 %vm404_vm0, %v2237_v42  ;;  %1289 = vmatpush1.msra.mxu1 %v2229_v38 }
 0x434   : > { %v2241_v44 = vpop.eup %2240  ;;  %2043 = vmatpush1.msk.msra.mxu0 %vm404_vm0, %v2239_v43  ;;  %1290 = vmatprep.subr.mxu1 %v2227_v37 }
 0x435   : > { %v2243_v45 = vpop.eup %2242  ;;  %1205 = vmatprep.subr.mxu0 %v2241_v44  ;;  %1291 = vmatpush1.msra.mxu1 %v2225_v36 }
 0x436   : > { %v2245_v46 = vpop.eup %2244  ;;  %1206 = vmatpush1.msra.mxu0 %v2243_v45  ;;  %2049 = vmatmul.mubr.msk.f32.vlgmr.msra.gmra.mxu1 %vm394_vm1, %v2502_v62 }
 0x437   : > { %v2247_v47 = vpop.eup %2246  ;;  %1207 = vmatprep.subr.mxu0 %v2245_v46  ;;  %1330 = vmatprep.mubr.f32.mxu1 %v2359_v12 }
 0x438   : > { %1208 = vmatpush1.msra.mxu0 %v2247_v47 }
 0x439   : > { %2044 = vmatmul.mubr.msk.f32.vlgmr.msra.gmra.mxu0 %vm394_vm1, %v2502_v62 }
 0x43a   : > { %1247 = vmatprep.mubr.f32.mxu0 %v2359_v12  ;;  %2050 = vmatmul.mubr.msk.f32.gmra.mxu1 %vm394_vm1, %v2510_v3 }
 0x43b   : > { %1336 = vmatprep.mubr.f32.mxu1 %v2359_v12 }
 0x43d   : > { %2045 = vmatmul.mubr.msk.f32.gmra.mxu0 %vm394_vm1, %v2510_v3 }
 0x43e   : > { %1253 = vmatprep.mubr.f32.mxu0 %v2359_v12  ;;  %2051 = vmatmul.mubr.msk.f32.gmra.mxu1 %vm394_vm1, %v2521_v4 }
 0x43f   : > { %1514 = vmatprep.mubr.f32.mxu1 %v2359_v12 }
 0x441   : > { %2046 = vmatmul.mubr.msk.f32.gmra.mxu0 %vm394_vm1, %v2521_v4 }
 0x442   : > { %1431 = vmatprep.mubr.f32.mxu0 %v2359_v12 }
 0x4f6   : > { %v1326_v48 = vpop.f32.mrf.mxu1 }
 0x4f7   : > { %v1327_v53 = vadd.f32 %v1326_v48, %v2534_v10 }
 0x4f8   : > { %v1328_v49 = vpop.f32.mrf.mxu1 }
 0x4f9   : > { %v1243_v50 = vpop.f32.mrf.mxu0  ;;  %v1329_v55 = vadd.f32 %v1328_v49, %v2534_v10  ;;  %2248 = vtanh.f32 %v1327_v53 }
 0x4fa   : > { %v1332_v51 = vpop.f32.mrf.mxu1  ;;  %v1244_v15 = vadd.f32 %v1243_v50, %v2534_v10 }
 0x4fb   : > { %v1245_v52 = vpop.f32.mrf.mxu0  ;;  %v1333_v57 = vadd.f32 %v1332_v51, %v2537_v17  ;;  %2250 = vtanh.f32 %v1329_v55 }
 0x4fc   : > { %v1334_v54 = vpop.f32.mrf.mxu1  ;;  %v1246_v11 = vadd.f32 %v1245_v52, %v2534_v10 }
 0x4fd   : > { %v1249_v56 = vpop.f32.mrf.mxu0  ;;  %v1335_v63 = vadd.f32 %v1334_v54, %v2537_v17  ;;  %2252 = vtanh.f32 %v1333_v57 }
 0x4fe   : > { %v1338_v58 = vpop.f32.mrf.mxu1  ;;  %v1250_v9 = vadd.f32 %v1249_v56, %v2537_v17 }
 0x4ff   : > { %v1251_v59 = vpop.f32.mrf.mxu0  ;;  %v1339_v60 = vadd.f32 %v1338_v58, %v2532_v5 }
 0x500   : > { %v1340_v61 = vpop.f32.mrf.mxu1  ;;  %v1252_v7 = vadd.f32 %v1251_v59, %v2537_v17 }
 0x501   : > { %v1255_v0 = vpop.f32.mrf.mxu0  ;;  %v1341_v1 = vadd.f32 %v1340_v61, %v2532_v5 }
 0x502   : > { %v1256_v2 = vadd.f32 %v1255_v0, %v2532_v5 }
 0x503   : > { %v1257_v6 = vpop.f32.mrf.mxu0  ;;  %2254 = vtanh.f32 %v1341_v1 }
 0x504   : > { %2256 = vtanh.f32 %v1339_v60  ;;  %v1258_v8 = vadd.f32 %v1257_v6, %v2532_v5 }
 0x505   : > { %2258 = vtanh.f32 %v1335_v63 }
 0x506   : > { %2260 = vtanh.f32 %v1258_v8  ;;  %v2249_v16 = vpop.eup %2248 }
 0x507   : > { %2262 = vtanh.f32 %v1256_v2 }
 0x508   : > { %2264 = vtanh.f32 %v1252_v7  ;;  %v2251_v19 = vpop.eup %2250 }
 0x509   : > { %2266 = vtanh.f32 %v1250_v9 }
 0x50a   : > { %2268 = vtanh.f32 %v1246_v11  ;;  %v2253_v20 = vpop.eup %2252 }
 0x50b   : > { %2270 = vtanh.f32 %v1244_v15 }
 0x510   : > { %v2255_v21 = vpop.eup %2254 }
 0x511   : > { %v2257_v22 = vpop.eup %2256  ;;  %2057 = vmatprep.subr.msk.mxu1 %vm404_vm0, %v2255_v21 }
 0x512   : > { %v2259_v23 = vpop.eup %2258  ;;  %2058 = vmatpush1.msk.msra.mxu1 %vm404_vm0, %v2257_v22 }
 0x513   : > { %v2261_v24 = vpop.eup %2260  ;;  %1478 = vmatprep.subr.mxu1 %v2259_v23 }
 0x514   : > { %v2263_v25 = vpop.eup %2262  ;;  %2052 = vmatprep.subr.msk.mxu0 %vm404_vm0, %v2261_v24  ;;  %1479 = vmatpush1.msra.mxu1 %v2253_v20 }
 0x515   : > { %v2265_v26 = vpop.eup %2264  ;;  %2053 = vmatpush1.msk.msra.mxu0 %vm404_vm0, %v2263_v25  ;;  %1480 = vmatprep.subr.mxu1 %v2251_v19 }
 0x516   : > { %v2267_v27 = vpop.eup %2266  ;;  %1395 = vmatprep.subr.mxu0 %v2265_v26  ;;  %1481 = vmatpush1.msra.mxu1 %v2249_v16 }
 0x517   : > { %v2269_v28 = vpop.eup %2268  ;;  %1396 = vmatpush1.msra.mxu0 %v2267_v27  ;;  %2059 = vmatmul.mubr.msk.f32.vlgmr.msra.gmra.mxu1 %vm394_vm1, %v2502_v62 }
 0x518   : > { %v2271_v29 = vpop.eup %2270  ;;  %1397 = vmatprep.subr.mxu0 %v2269_v28  ;;  %1520 = vmatprep.mubr.f32.mxu1 %v2359_v12 }
 0x519   : > { %1398 = vmatpush1.msra.mxu0 %v2271_v29  ;;  %v1723_v29 = vld [vmem:[%s2806_s5] sm:$0x1] }
 0x51a   : > { %2054 = vmatmul.mubr.msk.f32.vlgmr.msra.gmra.mxu0 %vm394_vm1, %v2502_v62 }
 0x51b   : > { %1437 = vmatprep.mubr.f32.mxu0 %v2359_v12  ;;  %2060 = vmatmul.mubr.msk.f32.gmra.mxu1 %vm394_vm1, %v2510_v3 }
 0x51c   : > { %1526 = vmatprep.mubr.f32.mxu1 %v2359_v12 }
 0x51e   : > { %2055 = vmatmul.mubr.msk.f32.gmra.mxu0 %vm394_vm1, %v2510_v3 }
 0x51f   : > { %1443 = vmatprep.mubr.f32.mxu0 %v2359_v12  ;;  %2061 = vmatmul.mubr.msk.f32.gmra.mxu1 %vm394_vm1, %v2521_v4 }
 0x520   : > { %1704 = vmatprep.mubr.f32.mxu1 %v2359_v12 }
 0x522   : > { %2056 = vmatmul.mubr.msk.f32.gmra.mxu0 %vm394_vm1, %v2521_v4 }
 0x523   : > { %1621 = vmatprep.mubr.f32.mxu0 %v2359_v12 }
 0x5d7   : > { %v1516_v30 = vpop.f32.mrf.mxu1 }
 0x5d8   : > { %v1517_v35 = vadd.f32 %v1516_v30, %v2534_v10 }
 0x5d9   : > { %v1518_v31 = vpop.f32.mrf.mxu1 }
 0x5da   : > { %v1433_v32 = vpop.f32.mrf.mxu0  ;;  %v1519_v37 = vadd.f32 %v1518_v31, %v2534_v10  ;;  %2272 = vtanh.f32 %v1517_v35 }
 0x5db   : > { %v1522_v33 = vpop.f32.mrf.mxu1  ;;  %v1434_v53 = vadd.f32 %v1433_v32, %v2534_v10  ;;  %v2360_v32 = vmov 1966171168  }
 0x5dc   : > { %v1435_v34 = vpop.f32.mrf.mxu0  ;;  %v1523_v39 = vadd.f32 %v1522_v33, %v2537_v17  ;;  %2274 = vtanh.f32 %v1519_v37  ;;  %v1898_v33 = vunpack.c.l.s4 %v2360_v32 }
 0x5dd   : > { %v1524_v36 = vpop.f32.mrf.mxu1  ;;  %v1436_v52 = vadd.f32 %v1435_v34, %v2534_v10 }
 0x5de   : > { %v1439_v38 = vpop.f32.mrf.mxu0  ;;  %v1525_v44 = vadd.f32 %v1524_v36, %v2537_v17  ;;  %2276 = vtanh.f32 %v1523_v39  ;;  %v1899_v35 = vunpack.c.0.s8 %v1898_v33 }
 0x5df   : > { %v1528_v40 = vpop.f32.mrf.mxu1  ;;  %v1440_v51 = vadd.f32 %v1439_v38, %v2537_v17 }
 0x5e0   : > { %v1441_v41 = vpop.f32.mrf.mxu0  ;;  %v1529_v42 = vadd.f32 %v1528_v40, %v2532_v5  ;;  %v1902_v40 = vsub.s32 %v1899_v35, %v2484_v14 }
 0x5e1   : > { %v1530_v43 = vpop.f32.mrf.mxu1  ;;  %v1442_v49 = vadd.f32 %v1441_v41, %v2537_v17 }
 0x5e2   : > { %v1445_v45 = vpop.f32.mrf.mxu0  ;;  %v1531_v46 = vadd.f32 %v1530_v43, %v2532_v5 }
 0x5e3   : > { %v1446_v47 = vadd.f32 %v1445_v45, %v2532_v5 }
 0x5e4   : > { %v1447_v48 = vpop.f32.mrf.mxu0  ;;  %2278 = vtanh.f32 %v1531_v46 }
 0x5e5   : > { %2280 = vtanh.f32 %v1529_v42  ;;  %v1448_v50 = vadd.f32 %v1447_v48, %v2532_v5 }
 0x5e6   : > { %2282 = vtanh.f32 %v1525_v44 }
 0x5e7   : > { %2284 = vtanh.f32 %v1448_v50  ;;  %v2273_v54 = vpop.eup %2272 }
 0x5e8   : > { %2286 = vtanh.f32 %v1446_v47 }
 0x5e9   : > { %2288 = vtanh.f32 %v1442_v49  ;;  %v2275_v55 = vpop.eup %2274 }
 0x5ea   : > { %2290 = vtanh.f32 %v1440_v51 }
 0x5eb   : > { %2292 = vtanh.f32 %v1436_v52  ;;  %v2277_v56 = vpop.eup %2276 }
 0x5ec   : > { %2294 = vtanh.f32 %v1434_v53 }
 0x5f1   : > { %v2279_v57 = vpop.eup %2278 }
 0x5f2   : > { %v2281_v58 = vpop.eup %2280  ;;  %2067 = vmatprep.subr.msk.mxu1 %vm404_vm0, %v2279_v57 }
 0x5f3   : > { %v2283_v59 = vpop.eup %2282  ;;  %2068 = vmatpush1.msk.msra.mxu1 %vm404_vm0, %v2281_v58 }
 0x5f4   : > { %v2285_v60 = vpop.eup %2284  ;;  %1668 = vmatprep.subr.mxu1 %v2283_v59 }
 0x5f5   : > { %v2287_v61 = vpop.eup %2286  ;;  %2062 = vmatprep.subr.msk.mxu0 %vm404_vm0, %v2285_v60  ;;  %1669 = vmatpush1.msra.mxu1 %v2277_v56 }
 0x5f6   : > { %v2289_v63 = vpop.eup %2288  ;;  %2063 = vmatpush1.msk.msra.mxu0 %vm404_vm0, %v2287_v61  ;;  %1670 = vmatprep.subr.mxu1 %v2275_v55 }
 0x5f7   : > { %v2291_v0 = vpop.eup %2290  ;;  %1585 = vmatprep.subr.mxu0 %v2289_v63  ;;  %1671 = vmatpush1.msra.mxu1 %v2273_v54 }
 0x5f8   : > { %v2293_v1 = vpop.eup %2292  ;;  %1586 = vmatpush1.msra.mxu0 %v2291_v0  ;;  %2069 = vmatmul.mubr.msk.f32.vlgmr.msra.gmra.mxu1 %vm394_vm1, %v2502_v62 }
 0x5f9   : > { %v2295_v2 = vpop.eup %2294  ;;  %1587 = vmatprep.subr.mxu0 %v2293_v1  ;;  %1710 = vmatprep.mubr.f32.mxu1 %v2359_v12 }
 0x5fa   : > { %1588 = vmatpush1.msra.mxu0 %v2295_v2 }
 0x5fb   : > { %2064 = vmatmul.mubr.msk.f32.vlgmr.msra.gmra.mxu0 %vm394_vm1, %v2502_v62 }
 0x5fc   : > { %1627 = vmatprep.mubr.f32.mxu0 %v2359_v12  ;;  %2070 = vmatmul.mubr.msk.f32.gmra.mxu1 %vm394_vm1, %v2510_v3 }
 0x5fd   : > { %1716 = vmatprep.mubr.f32.mxu1 %v2359_v12 }
 0x5ff   : > { %2065 = vmatmul.mubr.msk.f32.gmra.mxu0 %vm394_vm1, %v2510_v3 }
 0x600   : > { %1633 = vmatprep.mubr.f32.mxu0 %v2359_v12  ;;  %2071 = vmatmul.mubr.msk.f32.gmra.mxu1 %vm394_vm1, %v2521_v4 }
 0x601   : > { %1884 = vmatprep.mubr.f32.mxu1 %v2359_v12 }
 0x603   : > { %2066 = vmatmul.mubr.msk.f32.gmra.mxu0 %vm394_vm1, %v2521_v4 }
 0x604   : > { %1813 = vmatprep.mubr.f32.mxu0 %v2359_v12 }
 0x6b8   : > { %v1706_v62 = vpop.f32.mrf.mxu1 }
 0x6b9   : > { %v1707_v27 = vadd.f32 %v1706_v62, %v2534_v10 }
 0x6ba   : > { %v1708_v6 = vpop.f32.mrf.mxu1 }
 0x6bb   : > { %v1623_v7 = vpop.f32.mrf.mxu0  ;;  %v1709_v25 = vadd.f32 %v1708_v6, %v2534_v10 }
 0x6bc   : > { %v1712_v8 = vpop.f32.mrf.mxu1 }
 0x6bd   : > { %v1625_v9 = vpop.f32.mrf.mxu0  ;;  %v1713_v12 = vadd.f32 %v1712_v8, %v2537_v17 }
 0x6be   : > { %v1714_v11 = vpop.f32.mrf.mxu1  ;;  %v1626_v31 = vadd.f32 %v1625_v9, %v2534_v10 }
 0x6bf   : > { %v1629_v15 = vpop.f32.mrf.mxu0  ;;  %v1715_v23 = vadd.f32 %v1714_v11, %v2537_v17 }
 0x6c0   : > { %v1718_v3 = vpop.f32.mrf.mxu1  ;;  %v1630_v30 = vadd.f32 %v1629_v15, %v2537_v17 }
 0x6c1   : > { %v1631_v16 = vpop.f32.mrf.mxu0  ;;  %v1719_v22 = vadd.f32 %v1718_v3, %v2532_v5 }
 0x6c2   : > { %v1720_v19 = vpop.f32.mrf.mxu1  ;;  %v1632_v28 = vadd.f32 %v1631_v16, %v2537_v17  ;;  %v1728_v17 = vpop.permute.xlu1 %1727 }
 0x6c3   : > { %v1635_v20 = vpop.f32.mrf.mxu0  ;;  %v1721_v21 = vadd.f32 %v1720_v19, %v2532_v5  ;;  %v1733_v36 = vrot.slane %v1728_v17, %v301_v18 }
 0x6c4   : > { %v1636_v26 = vadd.f32 %v1635_v20, %v2532_v5 }
 0x6c5   : > { %v1637_v4 = vpop.f32.mrf.mxu0  ;;  %2075 = vmatprep.subr.msk.mxu1 %vm404_vm0, %v1721_v21 }
 0x6c6   : > { %v1638_v24 = vadd.f32 %v1637_v4, %v2532_v5  ;;  %2076 = vmatpush1.msk.msra.mxu1 %vm404_vm0, %v1719_v22  ;;  %v1624_v5 = vadd.f32 %v1623_v7, %v2534_v10 }
 0x6c7   : > { %1848 = vmatprep.subr.mxu1 %v1715_v23 }
 0x6c8   : > { %2072 = vmatprep.subr.msk.mxu0 %vm404_vm0, %v1638_v24  ;;  %1849 = vmatpush1.msra.mxu1 %v1713_v12 }
 0x6c9   : > { %2073 = vmatpush1.msk.msra.mxu0 %vm404_vm0, %v1636_v26  ;;  %1850 = vmatprep.subr.mxu1 %v1709_v25 }
 0x6ca   : > { %1777 = vmatprep.subr.mxu0 %v1632_v28  ;;  %1851 = vmatpush1.msra.mxu1 %v1707_v27 }
 0x6cb   : > { %1778 = vmatpush1.msra.mxu0 %v1630_v30  ;;  %2077 = vmatmul.mubr.msk.f32.vlgmr.msra.gmra.mxu1 %vm394_vm1, %v1723_v29 }
 0x6cc   : > { %1779 = vmatprep.subr.mxu0 %v1626_v31 }
 0x6cd   : > { %1780 = vmatpush1.msra.mxu0 %v1624_v5 }
 0x6ce   : > { %2074 = vmatmul.mubr.msk.f32.vlgmr.msra.gmra.mxu0 %vm394_vm1, %v1723_v29 }
 0x78b   : > { %v1886_v34 = vpop.f32.mrf.mxu1 }
 0x78c   : > { %v1887_v10 = vadd.f32 %v1886_v34, %v1733_v36 }
 0x78d   : > { %v1888_v37 = vpop.f32.mrf.mxu1 }
 0x78e   : > { %v1815_v38 = vpop.f32.mrf.mxu0  ;;  %v1889_v39 = vadd.f32 %v1888_v37, %v1733_v36 }
 0x78f   : > { %v1816_v43 = vadd.f32 %v1815_v38, %v1733_v36 }
 0x790   : > { %v1817_v41 = vpop.f32.mrf.mxu0  ;;  %v1896_v42 = vcombine.low %v1887_v10, %v1889_v39 }
 0x791   : > { %v1818_v44 = vadd.f32 %v1817_v41, %v1733_v36 }
 0x792   : > { %v1910_v46 = vrot.slane %v1896_v42, %v1902_v40 }
 0x793   : > { %v1895_v45 = vcombine.low %v1816_v43, %v1818_v44 }
 0x795   : > { %v1903_v47 = vrot.slane %v1895_v45, %v1902_v40 }
 0x797   : > { %v1911_v18 = vcombine.low %v1903_v47, %v1910_v46 }
 0x799   : > { %v1918_v48 = vrot.slane %v1911_v18, %v1902_v40 }
 0x79b   : > { %1924 = vst.msk [vmem:[%s272_s17] sm:$0xf] %vm1922_vm2, %v1918_v48 }
 0x79c   : > { %2309 = shalt.err (!%p2306_p3)
}
 0x79d   : > { %s2310_s30 = scalar_lea.hbm %s1938_s21, 64  ;;  %s2314_s14 = scalar_lea.hbm %s2808_s7, 128 }
 0x79e   : > { %p2311_p4 = scmp.ne.s32.totalorder %s1938_s21, %s2310_s30  ;;  %p2315_p9 = scmp.lt.s32.totalorder %s1938_s21, %s2808_s7 }
 0x79f   : > { %p2316_p10 = scmp.lt.s32.totalorder %s2314_s14, %s2310_s30 }
 0x7a0   : > { %p2312_p7 = pnand %p2311_p4, %p2443_p5 }
 0x7a1   : > { %p2317_p11 = por %p2316_p10, %p2315_p9 }
 0x7a2   : > { %p2313_p8 = pneg %p2312_p7 }
 0x7a4   : > { %p2318_p12 = pnand %p2317_p11, %p2313_p8 }
 0x7a6   : > { %2321 = shalt.err (!%p2318_p12)
}
 0x7a7   : > { %2084 = dma.vmem_to_hbm [thread:$0]  (%p2443_p5), %s1941_s18, 64, %s1938_s21, %s1926_s22  }
 0x7a8 PF: > { %p2090_p13 = scmp.ge.s32.totalorder %s2356_s29, 2  ;;  %s1952_s17 = sand.u32 1, %s2344_s26  }
 0x7a9   : > { %s1953_s19 = scalar_lea.sflag [#allocation4], %s1952_s17 }
 0x7aa   : > { %p2087_p0 = pnand %p2090_p13, %p2447_p6 }
 0x7ac   : > { %p2088_p1 = pneg %p2087_p0 }
 0x7ae   : > { %2339 = dma.done.wait (%p2088_p1), %s1953_s19, 64  }
 0x7af   : > { %2341 = vsyncadd (%p2088_p1), %s1953_s19, 4294967232  ;;  %p19_p2 = scmp.ge.s32.totalorder %s2430_s8, 4   ;;  %s2811_s26 = smov %s2348_s27 }
 0x7b0   : > { %s2812_s27 = smov %s2352_s28  ;;  %s2813_s28 = smov %s2441_s11 }
 0x7b1   : > { %s2814_s29 = smov %s2430_s8  ;;  %21 = sbr.rel (!%p19_p2) target bundleno = 6 (0x6), region = 83 }
 0x7b6   :  { %1958 = vsyncpa [#allocation4], 1 }
 0x7b7   :  { %1960 = vsyncpa [#allocation4 + $0x1], 1 }

</bundles_post_ra>
